<compile_context>
chip_gen: v6e
topology: v6e:2x2x1
jax: 0.10.0
libtpu: 0.0.40
codegen_flags: <defaults>
</compile_context>

<pallas_src>
import functools

import jax
import jax.numpy as jnp
from jax import lax
from jax.experimental import pallas as pl
from jax.experimental.pallas import tpu as pltpu


def _round_up(x, m):
    return ((x + m - 1) // m) * m


def _vector_mean_kernel(emb_ref, mask_ref, out_ref, acc_vec, acc_nrm, *,
                        eps, batch, seq, tb, ts, mask_b, mask_s):
    bi = pl.program_id(0)
    si = pl.program_id(1)

    @pl.when(si == 0)
    def _():
        acc_vec[...] = jnp.zeros_like(acc_vec)
        acc_nrm[...] = jnp.zeros_like(acc_nrm)

    m = mask_ref[...].astype(jnp.float32)          # (tb, ts), seq on lanes
    e = emb_ref[...].astype(jnp.float32)           # (tb, ts, H)

    if mask_b or mask_s:
        # Ragged tail: the out-of-bounds window contents are undefined, so we
        # must zero BOTH the mask and the embedding (0 * NaN = NaN otherwise).
        valid = None
        if mask_b:
            rows = lax.broadcasted_iota(jnp.int32, (tb, ts), 0) + bi * tb
            valid = rows < batch
        if mask_s:
            cols = lax.broadcasted_iota(jnp.int32, (tb, ts), 1) + si * ts
            v = cols < seq
            valid = v if valid is None else (valid & v)
        m = jnp.where(valid, m, 0.0)
        e = jnp.where(valid[:, :, None], e, 0.0)

    acc_vec[...] += jnp.sum(e * m[:, :, None], axis=1)     # (tb, H) masked sum
    acc_nrm[...] += jnp.sum(m, axis=1, keepdims=True)      # (tb, 1) mask count

    @pl.when(si == pl.num_programs(1) - 1)
    def _():
        out_ref[...] = (acc_vec[...] / (acc_nrm[...] + eps)).astype(out_ref.dtype)


def _vmem_budget_and_limit():
    """Per-chip VMEM footprint target and scoped-VMEM limit (bytes)."""
    phys = None
    try:
        phys = getattr(pltpu.get_tpu_info(), "vmem_capacity_bytes", None)
    except Exception:
        phys = None
    if not phys:
        phys = 64 << 20          # conservative fallback: v7x per-core VMEM
    phys = int(phys)
    # ~60% of physical for the accounted tile footprint (headroom for Mosaic
    # internal scratch and anything the estimate misses); scoped limit just
    # below physical so larger tiles are actually allowed to compile.
    budget = min(int(phys * 0.60), 96 << 20)
    limit = min(int(phys * 0.94), 120 << 20)
    return budget, limit


def _pick_tiles(B, S, H, in_bytes, mask_bytes, out_bytes,
                batch_tile, seq_tile, budget):
    """Pick (tb, ts) satisfying TPU layout constraints and the VMEM budget."""
    h_pad = _round_up(H, 128)

    def coerce_ts(t):
        # ts is the lane dim of the 2D mask block: multiple of 128 or full S.
        if S <= 128 or t >= S:
            return S
        return max(128, (t // 128) * 128)

    def coerce_tb(t):
        # tb is the sublane dim of the mask/output blocks: mult of 8 or full B.
        if B <= 8:
            return B
        cap = (B // 8) * 8                       # keep tb <= B
        return max(8, min(_round_up(t, 8), cap))

    def footprint(tb, ts):
        tb8 = _round_up(tb, 8)
        ts8 = _round_up(ts, 8)
        ts128 = _round_up(ts, 128)
        emb = 2 * tb8 * ts8 * h_pad * in_bytes        # double-buffered input tiles
        msk = 2 * tb8 * ts128 * max(mask_bytes, 1)    # double-buffered mask tiles
        out = 2 * tb8 * h_pad * out_bytes             # double-buffered output tile
        acc = tb8 * h_pad * 4 + tb8 * 128 * 4         # f32 accumulators
        inter = tb8 * ts8 * h_pad * 4                 # f32 product intermediate
        if in_bytes < 4:
            inter *= 2                                # + f32 upcast copy of the tile
        return emb + msk + out + acc + inter

    ts = coerce_ts(seq_tile if seq_tile is not None else 512)
    tb = coerce_tb(batch_tile if batch_tile is not None else 64)
    if batch_tile is None and B >= 16:
        # keep >= 2 batch tiles so the "parallel" axis can shard across cores
        tb = coerce_tb(min(tb, _round_up((B + 1) // 2, 8)))

    # Shrink to the VMEM budget: prefer shrinking tb (keeps long contiguous
    # (ts, H) HBM runs per DMA); only then shrink ts, never below 128 lanes.
    while footprint(tb, ts) > budget:
        if B > 8 and tb > 8:
            tb = coerce_tb(tb // 2)
        elif S > 128 and ts > 128:
            ts = coerce_ts(ts // 2)
        else:
            break
    return tb, ts


def vector_mean_head(embedding, attention_mask, *, eps=1e-8,
                     batch_tile=None, seq_tile=None):
    """Masked mean pooling over the sequence axis.

    embedding:      (B, S, H)
    attention_mask: (B, S)   (0/1 or float weights; bool/int/float dtypes OK)
    returns:        (B, H)   in embedding.dtype
    """
    B, S, H = embedding.shape
    assert attention_mask.shape == (B, S)

    if attention_mask.dtype == jnp.bool_:
        attention_mask = attention_mask.astype(jnp.int8)   # tiny; cast rest in-kernel

    out_dtype = embedding.dtype
    budget, vmem_limit = _vmem_budget_and_limit()
    tb, ts = _pick_tiles(
        B, S, H,
        jnp.dtype(embedding.dtype).itemsize,
        jnp.dtype(attention_mask.dtype).itemsize,
        jnp.dtype(out_dtype).itemsize,
        batch_tile, seq_tile, budget)

    grid = (pl.cdiv(B, tb), pl.cdiv(S, ts))   # (parallel batch, seq reduction)

    kernel = functools.partial(
        _vector_mean_kernel, eps=eps, batch=B, seq=S, tb=tb, ts=ts,
        mask_b=(B % tb != 0), mask_s=(S % ts != 0))

    return pl.pallas_call(
        kernel,
        out_shape=jax.ShapeDtypeStruct((B, H), out_dtype),
        grid_spec=pltpu.PrefetchScalarGridSpec(
            num_scalar_prefetch=0,
            grid=grid,
            in_specs=[
                pl.BlockSpec((tb, ts, H), lambda b, s: (b, s, 0)),  # embedding
                pl.BlockSpec((tb, ts), lambda b, s: (b, s)),        # mask (2D)
            ],
            out_specs=pl.BlockSpec((tb, H), lambda b, s: (b, 0)),
            scratch_shapes=[
                pltpu.VMEM((tb, H), jnp.float32),   # masked-sum accumulator
                pltpu.VMEM((tb, 1), jnp.float32),   # mask-count accumulator
            ],
        ),
        compiler_params=pltpu.CompilerParams(
            dimension_semantics=("parallel", "arbitrary"),
            vmem_limit_bytes=int(vmem_limit)),
    )(embedding, attention_mask)


def _reference(embedding, attention_mask, eps):
    norm = attention_mask.sum(axis=1, keepdims=True) + eps
    return (embedding * attention_mask[..., None]).sum(axis=1) / norm


if __name__ == "__main__":
    key = jax.random.PRNGKey(0)
    k1, k2, k3 = jax.random.split(key, 3)
    EPS = 1e-8

    # Case 1: tiny shapes, single grid step, everything divides.
    B, S, H = 2, 8, 128
    emb = jax.random.normal(k1, (B, S, H), jnp.float32)
    lengths = jnp.array([5, 8])
    mask = (jnp.arange(S)[None, :] < lengths[:, None]).astype(jnp.float32)

    out = jax.block_until_ready(vector_mean_head(emb, mask, eps=EPS))
    ref = _reference(emb, mask, EPS)
    assert out.shape == (B, H)
    assert jnp.allclose(out, ref, atol=1e-5, rtol=1e-4), \
        float(jnp.max(jnp.abs(out - ref)))

    # Case 2: ragged batch AND sequence tails (no wrapper padding) plus a
    # multi-step sequence reduction: tb=8 -> cdiv(10,8)=2 batch tiles (2nd
    # partial); ts=128 -> cdiv(160,128)=2 seq steps (2nd partial).
    B2, S2, H2 = 10, 160, 256
    emb2 = jax.random.normal(k2, (B2, S2, H2), jnp.float32)
    lengths2 = jax.random.randint(k3, (B2,), 1, S2 + 1)
    mask2 = (jnp.arange(S2)[None, :] < lengths2[:, None]).astype(jnp.float32)

    out2 = jax.block_until_ready(vector_mean_head(emb2, mask2, eps=EPS, seq_tile=128))
    ref2 = _reference(emb2, mask2, EPS)
    assert out2.shape == (B2, H2)
    assert jnp.allclose(out2, ref2, atol=1e-5, rtol=1e-4), \
        float(jnp.max(jnp.abs(out2 - ref2)))

    # Case 3: bf16 embedding + bool mask (in-kernel casts, f32 accumulation).
    B3, S3, H3 = 4, 32, 64
    emb3 = jax.random.normal(k1, (B3, S3, H3), jnp.float32)
    mask3 = jnp.arange(S3)[None, :] < jnp.array([32, 9, 1, 20])[:, None]   # bool
    out3 = jax.block_until_ready(
        vector_mean_head(emb3.astype(jnp.bfloat16), mask3, eps=EPS))
    ref3 = _reference(emb3, mask3.astype(jnp.float32), EPS)
    assert out3.shape == (B3, H3)
    assert jnp.allclose(out3.astype(jnp.float32), ref3, atol=3e-2, rtol=3e-2), \
        float(jnp.max(jnp.abs(out3.astype(jnp.float32) - ref3)))

    print("KERNEL_OK")
</pallas_src>

<mosaic_0001>
module attributes {stable_mosaic.version = 11 : i64} {
  func.func @_vector_mean_kernel(%arg0: i32, %arg1: i32, %arg2: memref<2x8x128xf32, #tpu.memory_space<vmem>>, %arg3: memref<2x8xf32, #tpu.memory_space<vmem>>, %arg4: memref<2x128xf32, #tpu.memory_space<vmem>>, %arg5: memref<2x128xf32, #tpu.memory_space<vmem>>, %arg6: memref<2x1xf32, #tpu.memory_space<vmem>>) attributes {dimension_semantics = [#tpu.dimension_semantics<parallel>, #tpu.dimension_semantics<arbitrary>], iteration_bounds = array<i64: 1, 1>, scalar_prefetch = 0 : i64, scratch_operands = 2 : i64, tpu.core_type = #tpu.core_type<tc>, window_params = [{transform_indices = @transform_0, window_bounds = array<i64: 2, 8, 128>}, {transform_indices = @transform_1, window_bounds = array<i64: 2, 8>}, {transform_indices = @transform_2, window_bounds = array<i64: 2, 128>}]} {
    %c0_i32 = arith.constant 0 : i32
    %0 = arith.cmpi eq, %arg1, %c0_i32 : i32
    %1 = arith.extui %0 : i1 to i32
    %c0_i32_0 = arith.constant 0 : i32
    %2 = arith.cmpi ne, %1, %c0_i32_0 : i32
    scf.if %2 {
      %cst_16 = arith.constant 0.000000e+00 : f32
      %20 = vector.broadcast %cst_16 : f32 to vector<2x128xf32>
      %c0_17 = arith.constant 0 : index
      %c0_18 = arith.constant 0 : index
      %21 = vector.load %arg5[%c0_17, %c0_18] : memref<2x128xf32, #tpu.memory_space<vmem>>, vector<2x128xf32>
      tpu.vector_store %arg5[%c0_17, %c0_18], %20 {strides = array<i32>} : memref<2x128xf32, #tpu.memory_space<vmem>>, vector<2x128xf32>,
      %cst_19 = arith.constant 0.000000e+00 : f32
      %22 = vector.broadcast %cst_19 : f32 to vector<2x1xf32>
      %c0_20 = arith.constant 0 : index
      %c0_21 = arith.constant 0 : index
      %23 = vector.load %arg6[%c0_20, %c0_21] : memref<2x1xf32, #tpu.memory_space<vmem>>, vector<2x1xf32>
      tpu.vector_store %arg6[%c0_20, %c0_21], %22 {strides = array<i32>} : memref<2x1xf32, #tpu.memory_space<vmem>>, vector<2x1xf32>,
    } else {
    }
    %c0 = arith.constant 0 : index
    %c0_1 = arith.constant 0 : index
    %3 = vector.load %arg3[%c0, %c0_1] : memref<2x8xf32, #tpu.memory_space<vmem>>, vector<2x8xf32>
    %c0_2 = arith.constant 0 : index
    %c0_3 = arith.constant 0 : index
    %c0_4 = arith.constant 0 : index
    %4 = vector.load %arg2[%c0_2, %c0_3, %c0_4] : memref<2x8x128xf32, #tpu.memory_space<vmem>>, vector<2x8x128xf32>
    %c0_5 = arith.constant 0 : index
    %c0_6 = arith.constant 0 : index
    %5 = vector.load %arg5[%c0_5, %c0_6] : memref<2x128xf32, #tpu.memory_space<vmem>>, vector<2x128xf32>
    %6 = vector.shape_cast %3 : vector<2x8xf32> to vector<2x8x1xf32>
    %7 = vector.broadcast %6 : vector<2x8x1xf32> to vector<2x8x128xf32>
    %8 = arith.mulf %4, %7 : vector<2x8x128xf32>
    %cst = arith.constant dense<0.000000e+00> : vector<2x128xf32>
    %9 = vector.multi_reduction <add>, %8, %cst [1] : vector<2x8x128xf32> to vector<2x128xf32>
    %10 = arith.addf %5, %9 : vector<2x128xf32>
    %c0_7 = arith.constant 0 : index
    %c0_8 = arith.constant 0 : index
    %11 = vector.load %arg5[%c0_7, %c0_8] : memref<2x128xf32, #tpu.memory_space<vmem>>, vector<2x128xf32>
    tpu.vector_store %arg5[%c0_7, %c0_8], %10 {strides = array<i32>} : memref<2x128xf32, #tpu.memory_space<vmem>>, vector<2x128xf32>,
    %c0_9 = arith.constant 0 : index
    %c0_10 = arith.constant 0 : index
    %12 = vector.load %arg6[%c0_9, %c0_10] : memref<2x1xf32, #tpu.memory_space<vmem>>, vector<2x1xf32>
    %cst_11 = arith.constant dense<0.000000e+00> : vector<2xf32>
    %13 = vector.multi_reduction <add>, %3, %cst_11 [1] : vector<2x8xf32> to vector<2xf32>
    %14 = vector.shape_cast %13 : vector<2xf32> to vector<2x1xf32>
    %15 = arith.addf %12, %14 : vector<2x1xf32>
    %c0_12 = arith.constant 0 : index
    %c0_13 = arith.constant 0 : index
    %16 = vector.load %arg6[%c0_12, %c0_13] : memref<2x1xf32, #tpu.memory_space<vmem>>, vector<2x1xf32>
    tpu.vector_store %arg6[%c0_12, %c0_13], %15 {strides = array<i32>} : memref<2x1xf32, #tpu.memory_space<vmem>>, vector<2x1xf32>,
    %c0_i32_14 = arith.constant 0 : i32
    %17 = arith.cmpi eq, %arg1, %c0_i32_14 : i32
    %18 = arith.extui %17 : i1 to i32
    %c0_i32_15 = arith.constant 0 : i32
    %19 = arith.cmpi ne, %18, %c0_i32_15 : i32
    scf.if %19 {
      %c0_16 = arith.constant 0 : index
      %c0_17 = arith.constant 0 : index
      %20 = vector.load %arg5[%c0_16, %c0_17] : memref<2x128xf32, #tpu.memory_space<vmem>>, vector<2x128xf32>
      %c0_18 = arith.constant 0 : index
      %c0_19 = arith.constant 0 : index
      %21 = vector.load %arg6[%c0_18, %c0_19] : memref<2x1xf32, #tpu.memory_space<vmem>>, vector<2x1xf32>
      %cst_20 = arith.constant 9.99999993E-9 : f32
      %22 = vector.broadcast %cst_20 : f32 to vector<2x1xf32>
      %23 = arith.addf %21, %22 : vector<2x1xf32>
      %24 = vector.broadcast %23 : vector<2x1xf32> to vector<2x128xf32>
      %25 = arith.divf %20, %24 : vector<2x128xf32>
      %c0_21 = arith.constant 0 : index
      %c0_22 = arith.constant 0 : index
      %26 = vector.load %arg4[%c0_21, %c0_22] : memref<2x128xf32, #tpu.memory_space<vmem>>, vector<2x128xf32>
      tpu.vector_store %arg4[%c0_21, %c0_22], %25 {strides = array<i32>} : memref<2x128xf32, #tpu.memory_space<vmem>>, vector<2x128xf32>,
    } else {
    }
    return
  }
  func.func @transform_0(%arg0: i32, %arg1: i32) -> (i32, i32, i32) {
    %c0_i32 = arith.constant 0 : i32
    %c0_i32_0 = arith.constant 0 : i32
    return %arg0, %arg1, %c0_i32 : i32, i32, i32
  }
  func.func @transform_1(%arg0: i32, %arg1: i32) -> (i32, i32) {
    %c0_i32 = arith.constant 0 : i32
    return %arg0, %arg1 : i32, i32
  }
  func.func @transform_2(%arg0: i32, %arg1: i32) -> (i32, i32) {
    %c0_i32 = arith.constant 0 : i32
    %c0_i32_0 = arith.constant 0 : i32
    return %arg0, %c0_i32 : i32, i32
  }
}

</mosaic_0001>

<bundles_post_ra>
// kernel: tpu_custom_call.1
= control target key start
LH: loop header
LB: loop body
LE: loop exit
PB: predicated region body
PF: predicated region fallthrough
CT: control target
= control target key end

     0   :  { %7 = vsyncpa [#allocation5], 0  ;;  %s232_s0 = inlined_call_operand.hbm [shape: f32[2,8,128], index: 0, kind: input, shape index: {}]   ;;  %s233_s1 = inlined_call_operand.hbm [shape: f32[2,8], index: 1, kind: input, shape index: {}]   ;;  %s234_s2 = inlined_call_operand.hbm [shape: f32[2,128], index: 2, kind: output, shape index: {}]  }
   0x1   :  { %8 = vsyncpa [#allocation8], 0 }
   0x2   :  { %9 = vsyncpa [#allocation6], 0  ;;  %s199_s9 = smov [#allocation4]  }
   0x3   :  { %s15_s10 = sshll.u32 %s199_s9, 4  ;;  %s16_s10 = int_to_ptr.vmem [resolvable:$true] %s15_s10 }
   0x4   :  { %s141_s11 = scalar_lea.vmem %s16_s10, 256  ;;  %p146_p1 = scmp.lt.s32.totalorder %s16_s10, %s16_s10 }
   0x5   :  { %p142_p0 = scmp.ne.s32.totalorder %s16_s10, %s141_s11  ;;  %p147_p2 = scmp.lt.s32.totalorder %s141_s11, %s141_s11 }
   0x7   :  { %p148_p3 = por %p147_p2, %p146_p1 }
   0x9   :  { %p149_p4 = pnand %p148_p3, %p142_p0 }
   0xb   :  { %152 = shalt.err (!%p149_p4)
}
   0xc   :  { %s200_s12 = smov 128   ;;  %s201_s13 = smov 8  }
   0xd   :  { %21 = dma.hbm_to_vmem [thread:$0]  %s232_s0, 256, %s16_s10, [#allocation5], %s200_s12, %s200_s12, %s201_s13  }
   0xe   :  { %s202_s16 = smov [#allocation7]  }
   0xf   :  { %s28_s17 = sshll.u32 %s202_s16, 4  ;;  %s29_s17 = int_to_ptr.vmem [resolvable:$true] %s28_s17 }
  0x10   :  { %s161_s18 = scalar_lea.vmem %s29_s17, 32  ;;  %p166_p6 = scmp.lt.s32.totalorder %s29_s17, %s29_s17 }
  0x11   :  { %p162_p5 = scmp.ne.s32.totalorder %s29_s17, %s161_s18  ;;  %p167_p7 = scmp.lt.s32.totalorder %s161_s18, %s161_s18 }
  0x13   :  { %p168_p8 = por %p167_p7, %p166_p6 }
  0x15   :  { %p169_p9 = pnand %p168_p8, %p162_p5 }
  0x17   :  { %172 = shalt.err (!%p169_p9)
}
  0x18   :  { %31 = dma.hbm_to_vmem [thread:$0]  %s233_s1, 32, %s29_s17, [#allocation8]  }
  0x19   :  { %193 = dma.done.wait [#allocation5], 256  }
  0x1a   :  { %194 = vsyncadd [#allocation5], 4294967040 }
  0x1b   :  { %195 = dma.done.wait [#allocation8], 32  }
  0x1c   :  { %196 = vsyncadd [#allocation8], 4294967264  ;;  %vm43_vm0 = vcmask 1024   ;;  %v203_v0 = vmov 0.0   ;;  %vm85_vm1 = vcmask 58368   ;;  %v49_v3 = vlaneseq  ;;  %v47_v10 = vld [vmem:[#allocation4 + $0x8] sm:$0xff] }
  0x1d   :  { %42 = vst [vmem:[#allocation2] sm:$0x3] %v203_v0  ;;  %44 = vst.msk [vmem:[#allocation3] sm:$0x3] %vm43_vm0, %v203_v0  ;;  %v45_v1 = vld [vmem:[#allocation7] sm:$0x3] }
  0x1e   :  { %v86_v2 = vsel %vm85_vm1, %v45_v1, 0.0  ;;  %v50_v4 = vshrl.u32 %v49_v3, 7  ;;  %v204_v7 = vmov 0   ;;  %v46_v18 = vld [vmem:[#allocation4] sm:$0xff]  ;;  %vm79_vm2 = vcmask 1041409   ;;  %s205_s0 = smov [#allocation9]  }
  0x1f   :  { %87 = vadd.xlane.f32.xlu0 %v86_v2  ;;  %129 = vset.pattern.permute.xlu1 %v204_v7  ;;  %s112_s1 = sshll.u32 %s205_s0, 4  ;;  %s113_s1 = int_to_ptr.vmem [resolvable:$true] %s112_s1 }
  0x20   :  { %v58_v5 = vsub.s32 1, %v50_v4  ;;  %130 = vset.pattern.permute.xlu0 %v204_v7  ;;  %v51_v8 = vsub.s32 0, %v50_v4  ;;  %s173_s21 = scalar_lea.vmem %s113_s1, 32  ;;  %p178_p11 = scmp.lt.s32.totalorder %s113_s1, %s113_s1 }
  0x21   :  { %p174_p10 = scmp.ne.s32.totalorder %s113_s1, %s173_s21  ;;  %p179_p12 = scmp.lt.s32.totalorder %s173_s21, %s173_s21 }
  0x22   :  { %v59_v6 = vrot.slane %v45_v1, %v58_v5  ;;  %v52_v9 = vrot.slane %v45_v1, %v51_v8 }
  0x23   :  { %p180_p13 = por %p179_p12, %p178_p11 }
  0x24   :  { %61 = vbcast.lane.b32.xlu1 %v59_v6, 256  ;;  %v84_v14 = vld [vmem:[#allocation3] sm:$0x3]  ;;  %v48_v32 = vld [vmem:[#allocation2] sm:$0x3] }
  0x25   :  { %p181_p0 = pnand %p180_p13, %p174_p10 }
  0x35   :  { %54 = vbcast.lane.b32.xlu0 %v52_v9, 256 }
  0x96   :  { %v62_v11 = vpop.permute.xlu1 %61 }
  0x97   :  { %v64_v12 = vmul.f32 %v62_v11, %v47_v10 }
  0x99   :  { %v71_v13 = vrot.slane %v64_v12, 4 }
  0x9b   :  { %v72_v15 = vadd.f32 %v71_v13, %v64_v12 }
  0x9d   :  { %v73_v19 = vrot.slane %v72_v15, 2 }
  0x9f   :  { %v74_v22 = vadd.f32 %v73_v19, %v72_v15 }
  0xa1   :  { %v75_v27 = vrot.slane %v74_v22, 1 }
  0xa3   :  { %v76_v30 = vadd.f32 %v75_v27, %v74_v22 }
  0xa8   :  { %v88_v16 = vpop.xlane.xlu0 %87 }
  0xa9   :  { %v89_v17 = vadd.f32 %v88_v16, %v84_v14 }
  0xab   :  { %91 = vst.msk [vmem:[#allocation3] sm:$0x3] %vm43_vm0, %v89_v17 }
  0xac   :  { %v55_v20 = vpop.permute.xlu0 %54 }
  0xad   :  { %v63_v21 = vmul.f32 %v55_v20, %v46_v18 }
  0xaf   :  { %v65_v23 = vrot.slane %v63_v21, 4 }
  0xb1   :  { %v66_v24 = vadd.f32 %v65_v23, %v63_v21 }
  0xb2   :  { %v96_v25 = vld [vmem:[#allocation3] sm:$0x3] }
  0xb3   :  { %v97_v26 = vadd.f32 1e-08, %v96_v25  ;;  %v67_v28 = vrot.slane %v66_v24, 2 }
  0xb5   :  { %100 = vperm.xlu1 %129, %v97_v26   ;;  %v68_v29 = vadd.f32 %v67_v28, %v66_v24 }
  0xb7   :  { %v69_v31 = vrot.slane %v68_v29, 1 }
  0xb9   :  { %v70_v33 = vadd.f32 %v69_v31, %v68_v29 }
  0xbb   :  { %v80_v34 = vsel %vm79_vm2, %v76_v30, %v70_v33 }
  0xbc   :  { %v82_v35 = vadd.f32 %v80_v34, %v48_v32 }
  0xbe   :  { %83 = vst [vmem:[#allocation2] sm:$0x3] %v82_v35 }
  0xc5   :  { %v95_v38 = vld [vmem:[#allocation2] sm:$0x3] }
 0x130   :  { %v101_v36 = vpop.permute.xlu1 %100 }
 0x131   :  { %131 = vrcp.f32 %v101_v36 }
 0x13e   :  { %v132_v37 = vpop.eup %131 }
 0x13f   :  { %v104_v39 = vmul.f32 %v132_v37, %v95_v38 }
 0x141   :  { %105 = vst [vmem:[#allocation9] sm:$0x3] %v104_v39 }
 0x142   :  { %184 = shalt.err (!%p181_p0)
}
 0x143   :  { %115 = dma.vmem_to_hbm [thread:$0]  %s113_s1, 32, %s234_s2, [#allocation6]  }
 0x144   :  { %197 = dma.done.wait [#allocation6], 32  }
 0x145   :  { %198 = vsyncadd [#allocation6], 4294967264 }
 0x146   :  { %119 = vsyncpa [#allocation5], 1 }
 0x147   :  { %120 = vsyncpa [#allocation8], 1 }
 0x148   :  { %121 = vsyncpa [#allocation6], 1 }

</bundles_post_ra>
